<compile_context>
chip_gen: v6e
topology: v6e:2x2x1
jax: 0.10.0
libtpu: 0.0.40
codegen_flags: <defaults>
</compile_context>

<pallas_src>
import jax
import jax.numpy as jnp
from jax import lax
from jax.experimental import pallas as pl
from jax.experimental.pallas import tpu as pltpu


def _round_up(x, m):
    return ((x + m - 1) // m) * m


def _linear_relu_kernel_single_k(x_ref, w_ref, b_ref, o_ref):
    """Whole K reduction in one tile: no scratch, no pl.when.

    x_ref: (tm, tk)  activations (K zero-padded)
    w_ref: (tk, tn)  weight already in (K, N) layout
    b_ref: (1, tn)   bias with the module's '+1' folded in
    o_ref: (tm, tn)  output tile
    """
    acc = jnp.dot(x_ref[...], w_ref[...], preferred_element_type=jnp.float32)
    o_ref[...] = jnp.maximum(acc + b_ref[...], jnp.float32(0.0)).astype(o_ref.dtype)


def _linear_relu_kernel_multi_k(x_ref, w_ref, b_ref, o_ref, acc_ref):
    """K reduction along grid axis 2 with a resident f32 VMEM accumulator."""
    k = pl.program_id(2)

    @pl.when(k == 0)
    def _init():
        acc_ref[...] = jnp.zeros_like(acc_ref)

    acc_ref[...] += jnp.dot(x_ref[...], w_ref[...],
                            preferred_element_type=jnp.float32)

    @pl.when(k == pl.num_programs(2) - 1)
    def _finalize():
        v = acc_ref[...] + b_ref[...]           # bias already contains the +1
        o_ref[...] = jnp.maximum(v, jnp.float32(0.0)).astype(o_ref.dtype)


def _choose_tiles(B, OUT, IN, tm_pref=512, tn_pref=512, tk_pref=512):
    # K tile: multiple of 128 (lane dim of x / leading dim of w_t).
    tk = tk_pref if IN > tk_pref else _round_up(IN, 128)
    # M tile: sublane multiple of 8, or the exact dim when tiny.
    if B <= 8:
        tm = B
    elif B > tm_pref:
        tm = tm_pref
    else:
        tm = _round_up(B, 8)
    # N tile: lane multiple of 128, or the exact dim when tiny.
    if OUT <= 128:
        tn = OUT if OUT < 128 else 128
    elif OUT > tn_pref:
        tn = tn_pref
    else:
        tn = _round_up(OUT, 128)
    # v7x has 2 TensorCores: make sure a 'parallel' axis has >= 2 blocks when
    # the batch is big enough to split (otherwise one core sits idle).
    if pl.cdiv(B, tm) == 1 and pl.cdiv(OUT, tn) == 1 and B > 16:
        tm = max(8, _round_up(pl.cdiv(B, 2), 8))
    return tm, tn, tk


def prepare_linear_params(weight, bias, tk):
    """One-time per-weight preprocessing, hoisted out of the per-call path.

    weight: (OUT, IN) PyTorch nn.Linear layout.
    Returns:
      w_t: (K_pad, OUT) f32 -- transposed to (K, N) so the MXU contracts x's
           last dim against w_t's first dim; K zero-padded to a multiple of tk
           so the reduction stays exact with no in-kernel masking.
      b2:  (1, OUT)     f32 -- bias with the module's '+1' folded in.
    """
    OUT, IN = weight.shape
    K_pad = _round_up(IN, tk)
    w_t = jnp.pad(weight.T, ((0, K_pad - IN), (0, 0)))
    b2 = (bias + jnp.float32(1.0)).reshape(1, OUT)
    return w_t, b2


def linear_add_relu(x, w_t, b2, *, tm, tn, tk):
    """y = relu(x @ W.T + b + 1), with W already prepared as w_t (K_pad, OUT)."""
    B, IN = x.shape
    K_pad, OUT = w_t.shape

    # Only K needs padding (reduction correctness). M/N edge tiles are handled
    # by Pallas with masked stores -> no extra HBM pad/slice passes.
    x_p = x if K_pad == IN else jnp.pad(x, ((0, 0), (0, K_pad - IN)))

    gm = pl.cdiv(B, tm)
    gn = pl.cdiv(OUT, tn)
    gk = K_pad // tk

    cost = pl.CostEstimate(
        flops=2 * B * OUT * K_pad,
        bytes_accessed=4 * (B * K_pad + K_pad * OUT + OUT + B * OUT),
        transcendentals=0,
    )
    out_shape = jax.ShapeDtypeStruct((B, OUT), x.dtype)

    if gk == 1:
        # Fast path: the whole reduction fits one tile (the module's IN=3 case).
        return pl.pallas_call(
            _linear_relu_kernel_single_k,
            out_shape=out_shape,
            grid=(gm, gn),
            in_specs=[
                pl.BlockSpec((tm, tk), lambda i, j: (i, 0)),   # x
                pl.BlockSpec((tk, tn), lambda i, j: (0, j)),   # w_t (K, N)
                pl.BlockSpec((1, tn), lambda i, j: (0, j)),    # bias (+1 folded)
            ],
            out_specs=pl.BlockSpec((tm, tn), lambda i, j: (i, j)),
            compiler_params=pltpu.CompilerParams(
                dimension_semantics=("parallel", "parallel")),
            cost_estimate=cost,
        )(x_p, w_t, b2)

    return pl.pallas_call(
        _linear_relu_kernel_multi_k,
        out_shape=out_shape,
        grid=(gm, gn, gk),
        in_specs=[
            pl.BlockSpec((tm, tk), lambda i, j, k: (i, k)),    # x
            pl.BlockSpec((tk, tn), lambda i, j, k: (k, j)),    # w_t (K, N)
            pl.BlockSpec((1, tn), lambda i, j, k: (0, j)),     # bias (+1 folded)
        ],
        out_specs=pl.BlockSpec((tm, tn), lambda i, j, k: (i, j)),
        scratch_shapes=[pltpu.VMEM((tm, tn), jnp.float32)],
        compiler_params=pltpu.CompilerParams(
            dimension_semantics=("parallel", "parallel", "arbitrary")),
        cost_estimate=cost,
    )(x_p, w_t, b2)


def model_forward(x, weight, bias):
    """Full module forward: relu(Linear(x) + 1)."""
    B, IN = x.shape
    OUT = weight.shape[0]
    tm, tn, tk = _choose_tiles(B, OUT, IN)
    w_t, b2 = prepare_linear_params(weight, bias, tk)   # hoistable per-weight work
    return linear_add_relu(x, w_t, b2, tm=tm, tn=tn, tk=tk)


if __name__ == "__main__":
    key = jax.random.PRNGKey(0)
    kx, kw, kb = jax.random.split(key, 3)

    # Shapes implied by the module: Linear(in_features=3, out_features=1).
    # batch=2 keeps it small but non-trivial.
    B, IN, OUT = 2, 3, 1
    x = jax.random.normal(kx, (B, IN), dtype=jnp.float32)
    weight = jax.random.normal(kw, (OUT, IN), dtype=jnp.float32) * 0.5
    bias = jax.random.normal(kb, (OUT,), dtype=jnp.float32) * 0.1

    out = jax.block_until_ready(model_forward(x, weight, bias))
    ref = jnp.maximum(x @ weight.T + bias + 1.0, 0.0)
    assert out.shape == (B, OUT)
    assert jnp.allclose(out, ref, atol=1e-5), (out, ref)

    # Second check: exercises the multi-K accumulator path, ragged M/N edge
    # tiles (no wrapper-side M/N padding) and the 2-block parallel grid split.
    kx2, kw2, kb2 = jax.random.split(jax.random.PRNGKey(1), 3)
    B2, IN2, OUT2 = 300, 1536, 260
    x2 = jax.random.normal(kx2, (B2, IN2), dtype=jnp.float32)
    w2 = jax.random.normal(kw2, (OUT2, IN2), dtype=jnp.float32) * 0.02
    b2_ = jax.random.normal(kb2, (OUT2,), dtype=jnp.float32) * 0.1
    out2 = jax.block_until_ready(model_forward(x2, w2, b2_))
    ref2 = jnp.maximum(
        jnp.dot(x2, w2.T, precision=lax.Precision.HIGHEST) + b2_ + 1.0, 0.0)
    assert out2.shape == (B2, OUT2)
    assert jnp.allclose(out2, ref2, atol=2e-3, rtol=2e-3), "tiled path mismatch"

    print("KERNEL_OK")
</pallas_src>

<mosaic_0001>
module attributes {stable_mosaic.version = 11 : i64} {
  func.func @_linear_relu_kernel_single_k(%arg0: i32, %arg1: i32, %arg2: memref<2x128xf32, #tpu.memory_space<vmem>>, %arg3: memref<128x1xf32, #tpu.memory_space<vmem>>, %arg4: memref<1x1xf32, #tpu.memory_space<vmem>>, %arg5: memref<2x1xf32, #tpu.memory_space<vmem>>) attributes {dimension_semantics = [#tpu.dimension_semantics<parallel>, #tpu.dimension_semantics<parallel>], iteration_bounds = array<i64: 1, 1>, scalar_prefetch = 0 : i64, scratch_operands = 0 : i64, tpu.core_type = #tpu.core_type<tc>, window_params = [{transform_indices = @transform_0, window_bounds = array<i64: 2, 128>}, {transform_indices = @transform_1, window_bounds = array<i64: 128, 1>}, {transform_indices = @transform_2, window_bounds = array<i64: 1, 1>}, {transform_indices = @transform_3, window_bounds = array<i64: 2, 1>}]} {
    %c0 = arith.constant 0 : index
    %c0_0 = arith.constant 0 : index
    %0 = vector.load %arg2[%c0, %c0_0] : memref<2x128xf32, #tpu.memory_space<vmem>>, vector<2x128xf32>
    %c0_1 = arith.constant 0 : index
    %c0_2 = arith.constant 0 : index
    %1 = vector.load %arg3[%c0_1, %c0_2] : memref<128x1xf32, #tpu.memory_space<vmem>>, vector<128x1xf32>
    %cst = arith.constant dense<0.000000e+00> : vector<2x1xf32>
    %2 = tpu.matmul %0, %1, %cst {dimension_numbers = #tpu.dot_dimension_numbers<[1], [0], [0], [1], [0, 0, 1, 1], [], []>} : vector<2x128xf32>, vector<128x1xf32>, vector<2x1xf32> -> vector<2x1xf32>
    %c0_3 = arith.constant 0 : index
    %c0_4 = arith.constant 0 : index
    %3 = vector.load %arg4[%c0_3, %c0_4] : memref<1x1xf32, #tpu.memory_space<vmem>>, vector<1x1xf32>
    %4 = vector.broadcast %3 : vector<1x1xf32> to vector<2x1xf32>
    %5 = arith.addf %2, %4 : vector<2x1xf32>
    %cst_5 = arith.constant 0.000000e+00 : f32
    %6 = vector.broadcast %cst_5 : f32 to vector<2x1xf32>
    %7 = arith.maximumf %5, %6 : vector<2x1xf32>
    %c0_6 = arith.constant 0 : index
    %c0_7 = arith.constant 0 : index
    %8 = vector.load %arg5[%c0_6, %c0_7] : memref<2x1xf32, #tpu.memory_space<vmem>>, vector<2x1xf32>
    tpu.vector_store %arg5[%c0_6, %c0_7], %7 {strides = array<i32>} : memref<2x1xf32, #tpu.memory_space<vmem>>, vector<2x1xf32>,
    return
  }
  func.func @transform_0(%arg0: i32, %arg1: i32) -> (i32, i32) {
    %c0_i32 = arith.constant 0 : i32
    %c0_i32_0 = arith.constant 0 : i32
    return %arg0, %c0_i32 : i32, i32
  }
  func.func @transform_1(%arg0: i32, %arg1: i32) -> (i32, i32) {
    %c0_i32 = arith.constant 0 : i32
    %c0_i32_0 = arith.constant 0 : i32
    return %c0_i32, %arg1 : i32, i32
  }
  func.func @transform_2(%arg0: i32, %arg1: i32) -> (i32, i32) {
    %c0_i32 = arith.constant 0 : i32
    %c0_i32_0 = arith.constant 0 : i32
    return %c0_i32, %arg1 : i32, i32
  }
  func.func @transform_3(%arg0: i32, %arg1: i32) -> (i32, i32) {
    %c0_i32 = arith.constant 0 : i32
    return %arg0, %arg1 : i32, i32
  }
}

</mosaic_0001>

<bundles_post_ra>
// kernel: tpu_custom_call.1
= control target key start
LH: loop header
LB: loop body
LE: loop exit
PB: predicated region body
PF: predicated region fallthrough
CT: control target
= control target key end

     0   :  { %v172_v0 = vmov 0.0   ;;  %vm173_vm0 = vmmov 0   ;;  %vm111_vm1 = vcmask 1024   ;;  %s251_s1 = inlined_call_operand.vmem [shape: f32[128,1], index: 1, kind: input, shape index: {}]   ;;  %s252_s2 = inlined_call_operand.<no memory space> [shape: f32[1,1], index: 2, kind: input, shape index: {}]   ;;  %s253_s0 = inlined_call_operand.vmem [shape: f32[2,128], index: 0, kind: input, shape index: {}]   ;;  %s254_s3 = inlined_call_operand.vmem [shape: f32[2,1], index: 3, kind: output, shape index: {}]  }
   0x1   :  { %135 = vmatprep.subr.mxu0 %v172_v0  ;;  %v32_v1 = vld [vmem:[%s251_s1 + $0x78] sm:$0xff]  ;;  %v31_v2 = vld [vmem:[%s251_s1 + $0x70] sm:$0xff]  ;;  %167 = vmatprep.mubr.msk.f32.mxu0 %vm173_vm0, %v172_v0  ;;  %v8_v3 = vstv %s252_s2  ;;  %v30_v4 = vld [vmem:[%s251_s1 + $0x68] sm:$0xff] }
   0x2   :  { %136 = vmatpush3.msra.mxu0 %v32_v1  ;;  %9 = vst [vmem:[#allocation2] sm:$0x1] %v8_v3  ;;  %v29_v5 = vld [vmem:[%s251_s1 + $0x60] sm:$0xff]  ;;  %v28_v6 = vld [vmem:[%s251_s1 + $0x58] sm:$0xff]  ;;  %v27_v7 = vld [vmem:[%s251_s1 + $0x50] sm:$0xff] }
   0x3   :  { %137 = vmatprep.subr.mxu0 %v172_v0  ;;  %v26_v8 = vld [vmem:[%s251_s1 + $0x48] sm:$0xff]  ;;  %v25_v9 = vld [vmem:[%s251_s1 + $0x40] sm:$0xff]  ;;  %v24_v10 = vld [vmem:[%s251_s1 + $0x38] sm:$0xff] }
   0x4   :  { %138 = vmatpush3.msra.mxu0 %v31_v2  ;;  %v23_v11 = vld [vmem:[%s251_s1 + $0x30] sm:$0xff]  ;;  %v22_v12 = vld [vmem:[%s251_s1 + $0x28] sm:$0xff]  ;;  %v21_v13 = vld [vmem:[%s251_s1 + $0x20] sm:$0xff] }
   0x5   :  { %139 = vmatprep.subr.mxu0 %v172_v0  ;;  %v20_v14 = vld [vmem:[%s251_s1 + $0x18] sm:$0xff]  ;;  %v19_v15 = vld [vmem:[%s251_s1 + $0x10] sm:$0xff]  ;;  %v18_v16 = vld [vmem:[%s251_s1 + $0x8] sm:$0xff] }
   0x6   :  { %140 = vmatpush3.msra.mxu0 %v30_v4  ;;  %v17_v17 = vld [vmem:[%s251_s1] sm:$0xff] }
   0x7   :  { %141 = vmatprep.subr.mxu0 %v172_v0  ;;  %v16_v18 = vld [vmem:[%s253_s0] sm:$0x3] }
   0x8   :  { %142 = vmatpush3.msra.mxu0 %v29_v5 }
   0x9   :  { %143 = vmatprep.subr.mxu0 %v172_v0  ;;  %v117_v19 = vld [vmem:[#allocation2] ss:$0 sm:$0xff] }
   0xa   :  { %144 = vmatpush3.msra.mxu0 %v28_v6 }
   0xb   :  { %145 = vmatprep.subr.mxu0 %v172_v0 }
   0xc   :  { %146 = vmatpush3.msra.mxu0 %v27_v7 }
   0xd   :  { %147 = vmatprep.subr.mxu0 %v172_v0 }
   0xe   :  { %148 = vmatpush3.msra.mxu0 %v26_v8 }
   0xf   :  { %149 = vmatprep.subr.mxu0 %v172_v0 }
  0x10   :  { %150 = vmatpush3.msra.mxu0 %v25_v9 }
  0x11   :  { %151 = vmatprep.subr.mxu0 %v172_v0 }
  0x12   :  { %152 = vmatpush3.msra.mxu0 %v24_v10 }
  0x13   :  { %153 = vmatprep.subr.mxu0 %v172_v0 }
  0x14   :  { %154 = vmatpush3.msra.mxu0 %v23_v11 }
  0x15   :  { %155 = vmatprep.subr.mxu0 %v172_v0 }
  0x16   :  { %156 = vmatpush3.msra.mxu0 %v22_v12 }
  0x17   :  { %157 = vmatprep.subr.mxu0 %v172_v0 }
  0x18   :  { %158 = vmatpush3.msra.mxu0 %v21_v13 }
  0x19   :  { %159 = vmatprep.subr.mxu0 %v172_v0 }
  0x1a   :  { %160 = vmatpush3.msra.mxu0 %v20_v14 }
  0x1b   :  { %161 = vmatprep.subr.mxu0 %v172_v0 }
  0x1c   :  { %162 = vmatpush3.msra.mxu0 %v19_v15 }
  0x1d   :  { %163 = vmatprep.subr.mxu0 %v172_v0 }
  0x1e   :  { %164 = vmatpush3.msra.mxu0 %v18_v16 }
  0x1f   :  { %165 = vmatprep.subr.mxu0 %v172_v0 }
  0x20   :  { %166 = vmatpush3.msra.mxu0 %v17_v17 }
  0x21   :  { %168 = vmatmul.mubr.f32.vlgmr.msra.gmra.mxu0 %v16_v18 }
  0xe1   :  { %v106_v20 = vpop.f32.mrf.mxu0 }
  0xe2   :  { %v107_v21 = vadd.f32 %v117_v19, %v106_v20 }
  0xe3   :  { %v169_v22 = vpop.f32.mrf.mxu0 }
  0xe4   :  { %v110_v23 = vmax.f32 %v107_v21, 0.0 }
  0xe6   :  { %112 = vst.msk [vmem:[%s254_s3] sm:$0x3] %vm111_vm1, %v110_v23 }

</bundles_post_ra>
